<compile_context>
chip_gen: v7x
topology: tpu7x:2x2x1
jax: 0.10.0
libtpu: 0.0.40
codegen_flags: <defaults>
</compile_context>

<pallas_src>
import functools

import jax
import jax.numpy as jnp
from jax import lax
from jax.experimental import pallas as pl
from jax.experimental.pallas import tpu as pltpu

BN_EPS = 1e-5
LANE = 128
SUB = 8


def _round_up(x, m):
    return (x + m - 1) // m * m


def _upsample_weights(l_in, l_out):
    """align_corners=True linear-resize gather indices / fractions (needs l_in >= 2)."""
    src = jnp.arange(l_out, dtype=jnp.float32) * (float(l_in - 1) / float(l_out - 1))
    lo = jnp.clip(jnp.floor(src).astype(jnp.int32), 0, l_in - 2)
    frac = src - lo.astype(jnp.float32)
    return lo, frac


# --------------------------------- kernels ---------------------------------

def _conv1_stats_kernel(x_ref, w_ref, h_ref, s_ref, *, taps, l_out):
    """conv1 on one batch: 3 accumulating MXU dots (L on lanes) + BN1 partial sums.
    Writes the raw conv output replicate-padded along L in a single dense store."""
    x = x_ref[0]                                            # (Cin_p, LpIn)
    y = jnp.dot(w_ref[0], x[:, 0:l_out], preferred_element_type=jnp.float32)
    for k in range(1, taps):
        y = y + jnp.dot(w_ref[k], x[:, k:k + l_out],
                        preferred_element_type=jnp.float32)  # (Cmid_p, l_out)
    # BN1 partial sums over the real columns only -> one aligned (C_p, 128) store.
    ssum = jnp.sum(y, axis=-1, keepdims=True)
    ssq = jnp.sum(y * y, axis=-1, keepdims=True)
    zs = jnp.zeros((y.shape[0], s_ref.shape[-1] - 2), jnp.float32)
    s_ref[0] = jnp.concatenate([ssum, ssq, zs], axis=-1)
    # Replicate-pad along L (BN affine + ReLU are per-channel elementwise, so padding
    # the raw conv output is equivalent) + zero tail up to the lane-aligned width.
    pieces = [y[:, :1], y, y[:, l_out - 1:l_out]]
    tail = h_ref.shape[-1] - (l_out + 2)
    if tail:
        pieces.append(jnp.zeros((y.shape[0], tail), jnp.float32))
    h_ref[0] = jnp.concatenate(pieces, axis=-1)


def _bn_conv2_stats_kernel(h_ref, a_ref, w_ref, y_ref, s_ref, *, taps, l_out):
    """BN1 affine + ReLU, conv2 as 3 accumulating MXU dots, BN2 partial sums."""
    hp = h_ref[0]                                           # (Cmid_p, LpMid), pre-padded
    act = jnp.maximum(hp * a_ref[:, 0:1] + a_ref[:, 1:2], 0.0)
    y = jnp.dot(w_ref[0], act[:, 0:l_out], preferred_element_type=jnp.float32)
    for k in range(1, taps):
        y = y + jnp.dot(w_ref[k], act[:, k:k + l_out],
                        preferred_element_type=jnp.float32)  # (Cout_p, l_out)
    ssum = jnp.sum(y, axis=-1, keepdims=True)
    ssq = jnp.sum(y * y, axis=-1, keepdims=True)
    zs = jnp.zeros((y.shape[0], s_ref.shape[-1] - 2), jnp.float32)
    s_ref[0] = jnp.concatenate([ssum, ssq, zs], axis=-1)
    tail = y_ref.shape[-1] - l_out
    if tail:
        y_ref[0] = jnp.concatenate(
            [y, jnp.zeros((y.shape[0], tail), jnp.float32)], axis=-1)
    else:
        y_ref[0] = y


def _bn_relu_out_kernel(y_ref, a_ref, o_ref):
    """BN2 affine + ReLU, writing the final unpadded NCL output directly."""
    c_out = o_ref.shape[1]
    l_out = o_ref.shape[2]
    y = y_ref[0][:c_out, :l_out]                            # (Cout, L2)
    out = jnp.maximum(y * a_ref[:, 0:1] + a_ref[:, 1:2], 0.0)
    o_ref[0] = out.astype(o_ref.dtype)


# --------------------------------- wrapper ---------------------------------

def _bn_affine(partial_stats, gamma, beta, count):
    """(N, C, 2) partial sums -> training-mode BN affine columns [scale | shift]."""
    tot = jnp.sum(partial_stats, axis=0)                    # (C, 2)
    mean = tot[:, 0] / count
    var = jnp.maximum(tot[:, 1] / count - mean * mean, 0.0)  # biased variance
    scale = gamma * lax.rsqrt(var + BN_EPS)
    return jnp.stack([scale, beta - mean * scale], axis=-1)  # (C, 2)


def up_forward(x_ncl, params):
    """Forward of `Up` (bilinear=True): x2 linear upsample + DoubleConv."""
    N, Cin, L = x_ncl.shape
    K, PAD = 3, 1                          # DoubleConv defaults used by Up; stride = 1
    w1, w2 = params["w1"], params["w2"]
    Cmid, Cout = int(w1.shape[0]), int(w2.shape[0])
    Cin_p, Cmid_p, Cout_p = (_round_up(c, SUB) for c in (Cin, Cmid, Cout))
    L1 = 2 * L                             # upsampled length; stride-1 "same" convs keep it
    L2 = L1
    LpIn = _round_up(L1 + 2 * PAD, LANE)   # lane-aligned input / intermediate widths
    LpMid = _round_up(L1 + 2 * PAD, LANE)
    LpOut = _round_up(L2, LANE)

    # ----- XLA glue (stays in NCL: channels on sublanes, L on lanes) -----
    xf = x_ncl.astype(jnp.float32)
    lo, frac = _upsample_weights(L, L1)
    f = frac[None, None, :]
    xu = xf[:, :, lo] * (1.0 - f) + xf[:, :, lo + 1] * f            # (N, Cin, L1)
    xu = jnp.pad(xu, ((0, 0), (0, 0), (PAD, PAD)), mode="edge")     # replicate pre-pad
    xu = jnp.pad(xu, ((0, 0), (0, Cin_p - Cin), (0, LpIn - (L1 + 2 * PAD))))

    def conv_weight(w, cout_p, cin_p):
        cout, cin, kk = w.shape
        wt = jnp.transpose(w, (2, 0, 1)).astype(jnp.float32)        # (K, Cout, Cin)
        return jnp.pad(wt, ((0, 0), (0, cout_p - cout), (0, cin_p - cin)))

    w1m = conv_weight(w1, Cmid_p, Cin_p)                            # (K, Cmid_p, Cin_p)
    w2m = conv_weight(w2, Cout_p, Cmid_p)                           # (K, Cout_p, Cmid_p)
    cpad = lambda v, cp: jnp.pad(v.astype(jnp.float32), (0, cp - v.shape[0]))
    # Note: conv biases b1/b2 are intentionally NOT used — cancelled by BN mean.

    cparams = pltpu.CompilerParams(dimension_semantics=("parallel",))

    # ----- Pallas call 1: conv1 + BN1 partial stats (grid over batch) -----
    h_pad, stats1 = pl.pallas_call(
        functools.partial(_conv1_stats_kernel, taps=K, l_out=L1),
        grid=(N,),
        in_specs=[pl.BlockSpec((1, Cin_p, LpIn), lambda n: (n, 0, 0)),
                  pl.BlockSpec((K, Cmid_p, Cin_p), lambda n: (0, 0, 0))],
        out_specs=[pl.BlockSpec((1, Cmid_p, LpMid), lambda n: (n, 0, 0)),
                   pl.BlockSpec((1, Cmid_p, LANE), lambda n: (n, 0, 0))],
        out_shape=[jax.ShapeDtypeStruct((N, Cmid_p, LpMid), jnp.float32),
                   jax.ShapeDtypeStruct((N, Cmid_p, LANE), jnp.float32)],
        compiler_params=cparams,
        cost_estimate=pl.CostEstimate(
            flops=2 * N * L1 * K * Cin_p * Cmid_p, transcendentals=0,
            bytes_accessed=4 * (N * Cin_p * LpIn + K * Cmid_p * Cin_p
                                + N * Cmid_p * (LpMid + LANE))),
    )(xu, w1m)

    aff1 = _bn_affine(stats1[:, :, :2], cpad(params["g1"], Cmid_p),
                      cpad(params["be1"], Cmid_p), N * L1)          # (Cmid_p, 2)

    # ----- Pallas call 2: BN1 + ReLU + conv2 + BN2 partial stats -----
    y_raw, stats2 = pl.pallas_call(
        functools.partial(_bn_conv2_stats_kernel, taps=K, l_out=L2),
        grid=(N,),
        in_specs=[pl.BlockSpec((1, Cmid_p, LpMid), lambda n: (n, 0, 0)),
                  pl.BlockSpec((Cmid_p, 2), lambda n: (0, 0)),
                  pl.BlockSpec((K, Cout_p, Cmid_p), lambda n: (0, 0, 0))],
        out_specs=[pl.BlockSpec((1, Cout_p, LpOut), lambda n: (n, 0, 0)),
                   pl.BlockSpec((1, Cout_p, LANE), lambda n: (n, 0, 0))],
        out_shape=[jax.ShapeDtypeStruct((N, Cout_p, LpOut), jnp.float32),
                   jax.ShapeDtypeStruct((N, Cout_p, LANE), jnp.float32)],
        compiler_params=cparams,
        cost_estimate=pl.CostEstimate(
            flops=2 * N * L2 * K * Cmid_p * Cout_p, transcendentals=0,
            bytes_accessed=4 * (N * Cmid_p * LpMid + Cmid_p * 2 + K * Cout_p * Cmid_p
                                + N * Cout_p * (LpOut + LANE))),
    )(h_pad, aff1, w2m)

    aff2 = _bn_affine(stats2[:, :Cout, :2], params["g2"].astype(jnp.float32),
                      params["be2"].astype(jnp.float32), N * L2)    # (Cout, 2)

    # ----- Pallas call 3: BN2 + ReLU, final unpadded NCL output -----
    out = pl.pallas_call(
        _bn_relu_out_kernel,
        grid=(N,),
        in_specs=[pl.BlockSpec((1, Cout_p, LpOut), lambda n: (n, 0, 0)),
                  pl.BlockSpec((Cout, 2), lambda n: (0, 0))],
        out_specs=pl.BlockSpec((1, Cout, L2), lambda n: (n, 0, 0)),
        out_shape=jax.ShapeDtypeStruct((N, Cout, L2), x_ncl.dtype),
        compiler_params=cparams,
    )(y_raw, aff2)

    return out                                                      # already (N, Cout, 2L)


# ----------------------------- pure-JAX reference -----------------------------

def _ref_up(x_ncl, params):
    N, C, L = x_ncl.shape
    lo, frac = _upsample_weights(L, 2 * L)
    f = frac[None, None, :]
    xu = x_ncl[:, :, lo] * (1.0 - f) + x_ncl[:, :, lo + 1] * f      # bilinear x2, align_corners

    def conv(x, w, b):
        xp = jnp.pad(x, ((0, 0), (0, 0), (1, 1)), mode="edge")
        y = lax.conv_general_dilated(xp, w, (1,), "VALID",
                                     dimension_numbers=("NCH", "OIH", "NCH"))
        return y + b[None, :, None]

    def bn_relu(y, g, be):
        mean = y.mean(axis=(0, 2), keepdims=True)
        var = ((y - mean) ** 2).mean(axis=(0, 2), keepdims=True)
        yn = (y - mean) / jnp.sqrt(var + BN_EPS)
        return jnp.maximum(yn * g[None, :, None] + be[None, :, None], 0.0)

    h = bn_relu(conv(xu, params["w1"], params["b1"]), params["g1"], params["be1"])
    return bn_relu(conv(h, params["w2"], params["b2"]), params["g2"], params["be2"])


# ----------------------------------- main -----------------------------------

if __name__ == "__main__":
    # Up(in_channels=8, out_channels=16, bilinear=True): DoubleConv mid = in//2
    N, C_IN, C_OUT, L = 2, 8, 16, 16
    C_MID = C_IN // 2
    K = 3

    key = jax.random.PRNGKey(0)
    ks = jax.random.split(key, 9)
    x = jax.random.normal(ks[0], (N, C_IN, L), jnp.float32)
    params = {
        "w1": 0.1 * jax.random.normal(ks[1], (C_MID, C_IN, K), jnp.float32),
        "b1": 0.1 * jax.random.normal(ks[2], (C_MID,), jnp.float32),
        "g1": 1.0 + 0.1 * jax.random.normal(ks[3], (C_MID,), jnp.float32),
        "be1": 0.1 * jax.random.normal(ks[4], (C_MID,), jnp.float32),
        "w2": 0.1 * jax.random.normal(ks[5], (C_OUT, C_MID, K), jnp.float32),
        "b2": 0.1 * jax.random.normal(ks[6], (C_OUT,), jnp.float32),
        "g2": 1.0 + 0.1 * jax.random.normal(ks[7], (C_OUT,), jnp.float32),
        "be2": 0.1 * jax.random.normal(ks[8], (C_OUT,), jnp.float32),
    }

    out = jax.jit(up_forward)(x, params)
    out = jax.block_until_ready(out)

    ref = _ref_up(x, params)
    assert out.shape == (N, C_OUT, 2 * L), out.shape
    err = float(jnp.max(jnp.abs(out - ref)))
    assert jnp.allclose(out, ref, atol=2e-4, rtol=2e-4), err

    print("KERNEL_OK")
</pallas_src>

<mosaic_0001>
module attributes {stable_mosaic.version = 11 : i64} {
  func.func @_conv1_stats_kernel(%arg0: i32, %arg1: memref<1x8x128xf32, #tpu.memory_space<vmem>>, %arg2: memref<3x8x8xf32, #tpu.memory_space<vmem>>, %arg3: memref<1x8x128xf32, #tpu.memory_space<vmem>>, %arg4: memref<1x8x128xf32, #tpu.memory_space<vmem>>) attributes {dimension_semantics = [#tpu.dimension_semantics<parallel>], iteration_bounds = array<i64: 2>, scalar_prefetch = 0 : i64, scratch_operands = 0 : i64, tpu.core_type = #tpu.core_type<tc>, window_params = [{transform_indices = @transform_0, window_bounds = array<i64: 1, 8, 128>}, {pipeline_mode = #tpu.pipeline_mode<synchronous>, transform_indices = @transform_1, window_bounds = array<i64: 3, 8, 8>}, {transform_indices = @transform_2, window_bounds = array<i64: 1, 8, 128>}, {transform_indices = @transform_3, window_bounds = array<i64: 1, 8, 128>}]} {
    %c0 = arith.constant 0 : index
    %c0_0 = arith.constant 0 : index
    %c0_1 = arith.constant 0 : index
    %0 = vector.load %arg1[%c0, %c0_0, %c0_1] : memref<1x8x128xf32, #tpu.memory_space<vmem>>, vector<1x8x128xf32>
    %1 = vector.shape_cast %0 : vector<1x8x128xf32> to vector<8x128xf32>
    %c0_2 = arith.constant 0 : index
    %c0_3 = arith.constant 0 : index
    %c0_4 = arith.constant 0 : index
    %2 = vector.load %arg2[%c0_2, %c0_3, %c0_4] : memref<3x8x8xf32, #tpu.memory_space<vmem>>, vector<1x8x8xf32>
    %3 = vector.shape_cast %2 : vector<1x8x8xf32> to vector<8x8xf32>
    %4 = vector.extract_strided_slice %1 {offsets = [0, 0], sizes = [8, 32], strides = [1, 1]} : vector<8x128xf32> to vector<8x32xf32>
    %cst = arith.constant dense<0.000000e+00> : vector<8x32xf32>
    %5 = tpu.matmul %3, %4, %cst {dimension_numbers = #tpu.dot_dimension_numbers<[1], [0], [0], [1], [0, 0, 1, 1], [], []>} : vector<8x8xf32>, vector<8x32xf32>, vector<8x32xf32> -> vector<8x32xf32>
    %c1 = arith.constant 1 : index
    %c0_5 = arith.constant 0 : index
    %c0_6 = arith.constant 0 : index
    %6 = vector.load %arg2[%c1, %c0_5, %c0_6] : memref<3x8x8xf32, #tpu.memory_space<vmem>>, vector<1x8x8xf32>
    %7 = vector.shape_cast %6 : vector<1x8x8xf32> to vector<8x8xf32>
    %8 = vector.extract_strided_slice %1 {offsets = [0, 1], sizes = [8, 32], strides = [1, 1]} : vector<8x128xf32> to vector<8x32xf32>
    %cst_7 = arith.constant dense<0.000000e+00> : vector<8x32xf32>
    %9 = tpu.matmul %7, %8, %cst_7 {dimension_numbers = #tpu.dot_dimension_numbers<[1], [0], [0], [1], [0, 0, 1, 1], [], []>} : vector<8x8xf32>, vector<8x32xf32>, vector<8x32xf32> -> vector<8x32xf32>
    %10 = arith.addf %5, %9 : vector<8x32xf32>
    %c2 = arith.constant 2 : index
    %c0_8 = arith.constant 0 : index
    %c0_9 = arith.constant 0 : index
    %11 = vector.load %arg2[%c2, %c0_8, %c0_9] : memref<3x8x8xf32, #tpu.memory_space<vmem>>, vector<1x8x8xf32>
    %12 = vector.shape_cast %11 : vector<1x8x8xf32> to vector<8x8xf32>
    %13 = vector.extract_strided_slice %1 {offsets = [0, 2], sizes = [8, 32], strides = [1, 1]} : vector<8x128xf32> to vector<8x32xf32>
    %cst_10 = arith.constant dense<0.000000e+00> : vector<8x32xf32>
    %14 = tpu.matmul %12, %13, %cst_10 {dimension_numbers = #tpu.dot_dimension_numbers<[1], [0], [0], [1], [0, 0, 1, 1], [], []>} : vector<8x8xf32>, vector<8x32xf32>, vector<8x32xf32> -> vector<8x32xf32>
    %15 = arith.addf %10, %14 : vector<8x32xf32>
    %cst_11 = arith.constant dense<0.000000e+00> : vector<8xf32>
    %16 = vector.multi_reduction <add>, %15, %cst_11 [1] : vector<8x32xf32> to vector<8xf32>
    %17 = vector.shape_cast %16 : vector<8xf32> to vector<8x1xf32>
    %18 = arith.mulf %15, %15 : vector<8x32xf32>
    %cst_12 = arith.constant dense<0.000000e+00> : vector<8xf32>
    %19 = vector.multi_reduction <add>, %18, %cst_12 [1] : vector<8x32xf32> to vector<8xf32>
    %20 = vector.shape_cast %19 : vector<8xf32> to vector<8x1xf32>
    %cst_13 = arith.constant 0.000000e+00 : f32
    %21 = vector.broadcast %cst_13 : f32 to vector<8x126xf32>
    %22 = tpu.concatenate %17, %20, %21 in 1 : vector<8x1xf32>, vector<8x1xf32>, vector<8x126xf32> -> vector<8x128xf32>
    %c0_14 = arith.constant 0 : index
    %c0_15 = arith.constant 0 : index
    %c0_16 = arith.constant 0 : index
    %23 = vector.load %arg4[%c0_14, %c0_15, %c0_16] : memref<1x8x128xf32, #tpu.memory_space<vmem>>, vector<1x8x128xf32>
    %24 = vector.shape_cast %23 : vector<1x8x128xf32> to vector<8x128xf32>
    %25 = vector.shape_cast %22 : vector<8x128xf32> to vector<1x8x128xf32>
    tpu.vector_store %arg4[%c0_14, %c0_15, %c0_16], %25 {strides = array<i32>} : memref<1x8x128xf32, #tpu.memory_space<vmem>>, vector<1x8x128xf32>,
    %26 = vector.extract_strided_slice %15 {offsets = [0, 0], sizes = [8, 1], strides = [1, 1]} : vector<8x32xf32> to vector<8x1xf32>
    %27 = vector.extract_strided_slice %15 {offsets = [0, 31], sizes = [8, 1], strides = [1, 1]} : vector<8x32xf32> to vector<8x1xf32>
    %cst_17 = arith.constant 0.000000e+00 : f32
    %28 = vector.broadcast %cst_17 : f32 to vector<8x94xf32>
    %29 = tpu.concatenate %26, %15, %27, %28 in 1 : vector<8x1xf32>, vector<8x32xf32>, vector<8x1xf32>, vector<8x94xf32> -> vector<8x128xf32>
    %c0_18 = arith.constant 0 : index
    %c0_19 = arith.constant 0 : index
    %c0_20 = arith.constant 0 : index
    %30 = vector.load %arg3[%c0_18, %c0_19, %c0_20] : memref<1x8x128xf32, #tpu.memory_space<vmem>>, vector<1x8x128xf32>
    %31 = vector.shape_cast %30 : vector<1x8x128xf32> to vector<8x128xf32>
    %32 = vector.shape_cast %29 : vector<8x128xf32> to vector<1x8x128xf32>
    tpu.vector_store %arg3[%c0_18, %c0_19, %c0_20], %32 {strides = array<i32>} : memref<1x8x128xf32, #tpu.memory_space<vmem>>, vector<1x8x128xf32>,
    return
  }
  func.func @transform_0(%arg0: i32) -> (i32, i32, i32) {
    %c0_i32 = arith.constant 0 : i32
    %c0_i32_0 = arith.constant 0 : i32
    %c0_i32_1 = arith.constant 0 : i32
    return %arg0, %c0_i32, %c0_i32_0 : i32, i32, i32
  }
  func.func @transform_1(%arg0: i32) -> (i32, i32, i32) {
    %c0_i32 = arith.constant 0 : i32
    %c0_i32_0 = arith.constant 0 : i32
    %c0_i32_1 = arith.constant 0 : i32
    %c0_i32_2 = arith.constant 0 : i32
    return %c0_i32, %c0_i32_0, %c0_i32_1 : i32, i32, i32
  }
  func.func @transform_2(%arg0: i32) -> (i32, i32, i32) {
    %c0_i32 = arith.constant 0 : i32
    %c0_i32_0 = arith.constant 0 : i32
    %c0_i32_1 = arith.constant 0 : i32
    return %arg0, %c0_i32, %c0_i32_0 : i32, i32, i32
  }
  func.func @transform_3(%arg0: i32) -> (i32, i32, i32) {
    %c0_i32 = arith.constant 0 : i32
    %c0_i32_0 = arith.constant 0 : i32
    %c0_i32_1 = arith.constant 0 : i32
    return %arg0, %c0_i32, %c0_i32_0 : i32, i32, i32
  }
}

module attributes {stable_mosaic.version = 11 : i64} {
  func.func @_bn_conv2_stats_kernel(%arg0: i32, %arg1: memref<1x8x128xf32, #tpu.memory_space<vmem>>, %arg2: memref<8x2xf32, #tpu.memory_space<vmem>>, %arg3: memref<3x16x8xf32, #tpu.memory_space<vmem>>, %arg4: memref<1x16x128xf32, #tpu.memory_space<vmem>>, %arg5: memref<1x16x128xf32, #tpu.memory_space<vmem>>) attributes {dimension_semantics = [#tpu.dimension_semantics<parallel>], iteration_bounds = array<i64: 2>, scalar_prefetch = 0 : i64, scratch_operands = 0 : i64, tpu.core_type = #tpu.core_type<tc>, window_params = [{transform_indices = @transform_0, window_bounds = array<i64: 1, 8, 128>}, {pipeline_mode = #tpu.pipeline_mode<synchronous>, transform_indices = @transform_1, window_bounds = array<i64: 8, 2>}, {pipeline_mode = #tpu.pipeline_mode<synchronous>, transform_indices = @transform_2, window_bounds = array<i64: 3, 16, 8>}, {transform_indices = @transform_3, window_bounds = array<i64: 1, 16, 128>}, {transform_indices = @transform_4, window_bounds = array<i64: 1, 16, 128>}]} {
    %c0 = arith.constant 0 : index
    %c0_0 = arith.constant 0 : index
    %c0_1 = arith.constant 0 : index
    %0 = vector.load %arg1[%c0, %c0_0, %c0_1] : memref<1x8x128xf32, #tpu.memory_space<vmem>>, vector<1x8x128xf32>
    %1 = vector.shape_cast %0 : vector<1x8x128xf32> to vector<8x128xf32>
    %c0_2 = arith.constant 0 : index
    %c0_3 = arith.constant 0 : index
    %2 = vector.load %arg2[%c0_2, %c0_3] : memref<8x2xf32, #tpu.memory_space<vmem>>, vector<8x1xf32>
    %3 = vector.broadcast %2 : vector<8x1xf32> to vector<8x128xf32>
    %4 = arith.mulf %1, %3 : vector<8x128xf32>
    %c0_4 = arith.constant 0 : index
    %c1 = arith.constant 1 : index
    %5 = vector.load %arg2[%c0_4, %c1] : memref<8x2xf32, #tpu.memory_space<vmem>>, vector<8x1xf32>
    %6 = vector.broadcast %5 : vector<8x1xf32> to vector<8x128xf32>
    %7 = arith.addf %4, %6 : vector<8x128xf32>
    %cst = arith.constant 0.000000e+00 : f32
    %8 = vector.broadcast %cst : f32 to vector<8x128xf32>
    %9 = arith.maximumf %7, %8 : vector<8x128xf32>
    %c0_5 = arith.constant 0 : index
    %c0_6 = arith.constant 0 : index
    %c0_7 = arith.constant 0 : index
    %10 = vector.load %arg3[%c0_5, %c0_6, %c0_7] : memref<3x16x8xf32, #tpu.memory_space<vmem>>, vector<1x16x8xf32>
    %11 = vector.shape_cast %10 : vector<1x16x8xf32> to vector<16x8xf32>
    %12 = vector.extract_strided_slice %9 {offsets = [0, 0], sizes = [8, 32], strides = [1, 1]} : vector<8x128xf32> to vector<8x32xf32>
    %cst_8 = arith.constant dense<0.000000e+00> : vector<16x32xf32>
    %13 = tpu.matmul %11, %12, %cst_8 {dimension_numbers = #tpu.dot_dimension_numbers<[1], [0], [0], [1], [0, 0, 1, 1], [], []>} : vector<16x8xf32>, vector<8x32xf32>, vector<16x32xf32> -> vector<16x32xf32>
    %c1_9 = arith.constant 1 : index
    %c0_10 = arith.constant 0 : index
    %c0_11 = arith.constant 0 : index
    %14 = vector.load %arg3[%c1_9, %c0_10, %c0_11] : memref<3x16x8xf32, #tpu.memory_space<vmem>>, vector<1x16x8xf32>
    %15 = vector.shape_cast %14 : vector<1x16x8xf32> to vector<16x8xf32>
    %16 = vector.extract_strided_slice %9 {offsets = [0, 1], sizes = [8, 32], strides = [1, 1]} : vector<8x128xf32> to vector<8x32xf32>
    %cst_12 = arith.constant dense<0.000000e+00> : vector<16x32xf32>
    %17 = tpu.matmul %15, %16, %cst_12 {dimension_numbers = #tpu.dot_dimension_numbers<[1], [0], [0], [1], [0, 0, 1, 1], [], []>} : vector<16x8xf32>, vector<8x32xf32>, vector<16x32xf32> -> vector<16x32xf32>
    %18 = arith.addf %13, %17 : vector<16x32xf32>
    %c2 = arith.constant 2 : index
    %c0_13 = arith.constant 0 : index
    %c0_14 = arith.constant 0 : index
    %19 = vector.load %arg3[%c2, %c0_13, %c0_14] : memref<3x16x8xf32, #tpu.memory_space<vmem>>, vector<1x16x8xf32>
    %20 = vector.shape_cast %19 : vector<1x16x8xf32> to vector<16x8xf32>
    %21 = vector.extract_strided_slice %9 {offsets = [0, 2], sizes = [8, 32], strides = [1, 1]} : vector<8x128xf32> to vector<8x32xf32>
    %cst_15 = arith.constant dense<0.000000e+00> : vector<16x32xf32>
    %22 = tpu.matmul %20, %21, %cst_15 {dimension_numbers = #tpu.dot_dimension_numbers<[1], [0], [0], [1], [0, 0, 1, 1], [], []>} : vector<16x8xf32>, vector<8x32xf32>, vector<16x32xf32> -> vector<16x32xf32>
    %23 = arith.addf %18, %22 : vector<16x32xf32>
    %cst_16 = arith.constant dense<0.000000e+00> : vector<16xf32>
    %24 = vector.multi_reduction <add>, %23, %cst_16 [1] : vector<16x32xf32> to vector<16xf32>
    %25 = vector.shape_cast %24 : vector<16xf32> to vector<16x1xf32>
    %26 = arith.mulf %23, %23 : vector<16x32xf32>
    %cst_17 = arith.constant dense<0.000000e+00> : vector<16xf32>
    %27 = vector.multi_reduction <add>, %26, %cst_17 [1] : vector<16x32xf32> to vector<16xf32>
    %28 = vector.shape_cast %27 : vector<16xf32> to vector<16x1xf32>
    %cst_18 = arith.constant 0.000000e+00 : f32
    %29 = vector.broadcast %cst_18 : f32 to vector<16x126xf32>
    %30 = tpu.concatenate %25, %28, %29 in 1 : vector<16x1xf32>, vector<16x1xf32>, vector<16x126xf32> -> vector<16x128xf32>
    %c0_19 = arith.constant 0 : index
    %c0_20 = arith.constant 0 : index
    %c0_21 = arith.constant 0 : index
    %31 = vector.load %arg5[%c0_19, %c0_20, %c0_21] : memref<1x16x128xf32, #tpu.memory_space<vmem>>, vector<1x16x128xf32>
    %32 = vector.shape_cast %31 : vector<1x16x128xf32> to vector<16x128xf32>
    %33 = vector.shape_cast %30 : vector<16x128xf32> to vector<1x16x128xf32>
    tpu.vector_store %arg5[%c0_19, %c0_20, %c0_21], %33 {strides = array<i32>} : memref<1x16x128xf32, #tpu.memory_space<vmem>>, vector<1x16x128xf32>,
    %cst_22 = arith.constant 0.000000e+00 : f32
    %34 = vector.broadcast %cst_22 : f32 to vector<16x96xf32>
    %35 = tpu.concatenate %23, %34 in 1 : vector<16x32xf32>, vector<16x96xf32> -> vector<16x128xf32>
    %c0_23 = arith.constant 0 : index
    %c0_24 = arith.constant 0 : index
    %c0_25 = arith.constant 0 : index
    %36 = vector.load %arg4[%c0_23, %c0_24, %c0_25] : memref<1x16x128xf32, #tpu.memory_space<vmem>>, vector<1x16x128xf32>
    %37 = vector.shape_cast %36 : vector<1x16x128xf32> to vector<16x128xf32>
    %38 = vector.shape_cast %35 : vector<16x128xf32> to vector<1x16x128xf32>
    tpu.vector_store %arg4[%c0_23, %c0_24, %c0_25], %38 {strides = array<i32>} : memref<1x16x128xf32, #tpu.memory_space<vmem>>, vector<1x16x128xf32>,
    return
  }
  func.func @transform_0(%arg0: i32) -> (i32, i32, i32) {
    %c0_i32 = arith.constant 0 : i32
    %c0_i32_0 = arith.constant 0 : i32
    %c0_i32_1 = arith.constant 0 : i32
    return %arg0, %c0_i32, %c0_i32_0 : i32, i32, i32
  }
  func.func @transform_1(%arg0: i32) -> (i32, i32) {
    %c0_i32 = arith.constant 0 : i32
    %c0_i32_0 = arith.constant 0 : i32
    %c0_i32_1 = arith.constant 0 : i32
    return %c0_i32, %c0_i32_0 : i32, i32
  }
  func.func @transform_2(%arg0: i32) -> (i32, i32, i32) {
    %c0_i32 = arith.constant 0 : i32
    %c0_i32_0 = arith.constant 0 : i32
    %c0_i32_1 = arith.constant 0 : i32
    %c0_i32_2 = arith.constant 0 : i32
    return %c0_i32, %c0_i32_0, %c0_i32_1 : i32, i32, i32
  }
  func.func @transform_3(%arg0: i32) -> (i32, i32, i32) {
    %c0_i32 = arith.constant 0 : i32
    %c0_i32_0 = arith.constant 0 : i32
    %c0_i32_1 = arith.constant 0 : i32
    return %arg0, %c0_i32, %c0_i32_0 : i32, i32, i32
  }
  func.func @transform_4(%arg0: i32) -> (i32, i32, i32) {
    %c0_i32 = arith.constant 0 : i32
    %c0_i32_0 = arith.constant 0 : i32
    %c0_i32_1 = arith.constant 0 : i32
    return %arg0, %c0_i32, %c0_i32_0 : i32, i32, i32
  }
}

module attributes {stable_mosaic.version = 11 : i64} {
  func.func @_bn_relu_out_kernel(%arg0: i32, %arg1: memref<1x16x128xf32, #tpu.memory_space<vmem>>, %arg2: memref<16x2xf32, #tpu.memory_space<vmem>>, %arg3: memref<1x16x32xf32, #tpu.memory_space<vmem>>) attributes {dimension_semantics = [#tpu.dimension_semantics<parallel>], iteration_bounds = array<i64: 2>, scalar_prefetch = 0 : i64, scratch_operands = 0 : i64, tpu.core_type = #tpu.core_type<tc>, window_params = [{transform_indices = @transform_0, window_bounds = array<i64: 1, 16, 128>}, {pipeline_mode = #tpu.pipeline_mode<synchronous>, transform_indices = @transform_1, window_bounds = array<i64: 16, 2>}, {transform_indices = @transform_2, window_bounds = array<i64: 1, 16, 32>}]} {
    %c0 = arith.constant 0 : index
    %c0_0 = arith.constant 0 : index
    %c0_1 = arith.constant 0 : index
    %0 = vector.load %arg1[%c0, %c0_0, %c0_1] : memref<1x16x128xf32, #tpu.memory_space<vmem>>, vector<1x16x128xf32>
    %1 = vector.shape_cast %0 : vector<1x16x128xf32> to vector<16x128xf32>
    %2 = vector.extract_strided_slice %1 {offsets = [0, 0], sizes = [16, 32], strides = [1, 1]} : vector<16x128xf32> to vector<16x32xf32>
    %c0_2 = arith.constant 0 : index
    %c0_3 = arith.constant 0 : index
    %3 = vector.load %arg2[%c0_2, %c0_3] : memref<16x2xf32, #tpu.memory_space<vmem>>, vector<16x1xf32>
    %4 = vector.broadcast %3 : vector<16x1xf32> to vector<16x32xf32>
    %5 = arith.mulf %2, %4 : vector<16x32xf32>
    %c0_4 = arith.constant 0 : index
    %c1 = arith.constant 1 : index
    %6 = vector.load %arg2[%c0_4, %c1] : memref<16x2xf32, #tpu.memory_space<vmem>>, vector<16x1xf32>
    %7 = vector.broadcast %6 : vector<16x1xf32> to vector<16x32xf32>
    %8 = arith.addf %5, %7 : vector<16x32xf32>
    %cst = arith.constant 0.000000e+00 : f32
    %9 = vector.broadcast %cst : f32 to vector<16x32xf32>
    %10 = arith.maximumf %8, %9 : vector<16x32xf32>
    %c0_5 = arith.constant 0 : index
    %c0_6 = arith.constant 0 : index
    %c0_7 = arith.constant 0 : index
    %11 = vector.load %arg3[%c0_5, %c0_6, %c0_7] : memref<1x16x32xf32, #tpu.memory_space<vmem>>, vector<1x16x32xf32>
    %12 = vector.shape_cast %11 : vector<1x16x32xf32> to vector<16x32xf32>
    %13 = vector.shape_cast %10 : vector<16x32xf32> to vector<1x16x32xf32>
    tpu.vector_store %arg3[%c0_5, %c0_6, %c0_7], %13 {strides = array<i32>} : memref<1x16x32xf32, #tpu.memory_space<vmem>>, vector<1x16x32xf32>,
    return
  }
  func.func @transform_0(%arg0: i32) -> (i32, i32, i32) {
    %c0_i32 = arith.constant 0 : i32
    %c0_i32_0 = arith.constant 0 : i32
    %c0_i32_1 = arith.constant 0 : i32
    return %arg0, %c0_i32, %c0_i32_0 : i32, i32, i32
  }
  func.func @transform_1(%arg0: i32) -> (i32, i32) {
    %c0_i32 = arith.constant 0 : i32
    %c0_i32_0 = arith.constant 0 : i32
    %c0_i32_1 = arith.constant 0 : i32
    return %c0_i32, %c0_i32_0 : i32, i32
  }
  func.func @transform_2(%arg0: i32) -> (i32, i32, i32) {
    %c0_i32 = arith.constant 0 : i32
    %c0_i32_0 = arith.constant 0 : i32
    %c0_i32_1 = arith.constant 0 : i32
    return %arg0, %c0_i32, %c0_i32_0 : i32, i32, i32
  }
}

</mosaic_0001>

<bundles_post_ra>
// kernel: up_forward.5
= control target key start
LH: loop header
LB: loop body
LE: loop exit
PB: predicated region body
PF: predicated region fallthrough
CT: control target
= control target key end

     0   :  { %7 = vsyncpa [#allocation3], 0  ;;  %s502_s0 = inlined_call_operand.vmem [shape: f32[2,16,128], index: 0, kind: input, shape index: {}]   ;;  %s503_s1 = inlined_call_operand.vmem [shape: f32[16,2], index: 1, kind: input, shape index: {}]   ;;  %s504_s2 = inlined_call_operand.hbm [shape: f32[2,16,32], index: 2, kind: output, shape index: {}]  }
   0x1   :  { %9 = vsyncpa [#allocation3 + $0x1], 0  ;;  %s393_s9 = smov 0   ;;  %s395_s10 = smov 0  }
   0x2   :  { %s397_s11 = smov 0   ;;  %s399_s12 = smov 0  }
   0x3 LB: > { %s414_s13 = sadd.s32 4294967295, %s371_s12   ;;  %s249_s14 = sadd.s32 4294967294, %s371_s12   ;;  %s371_s12 = sphi %s399_s12, %s510_s12   ;;  %s367_s11 = sphi %s397_s11, %s509_s11   ;;  %s363_s10 = sphi %s395_s10, %s508_s10   ;;  %s359_s9 = sphi %s393_s9, %s507_s9  }
   0x4   : > { %s418_s15 = sadd.s32 1, %s371_s12   ;;  %s69_s16 = sadd.s32 1, %s367_s11 }
   0x5   : > { %s66_s17 = ssub.s32 %s371_s12, %s418_s15  ;;  %p79_p0 = scmp.ne.s32.totalorder %s367_s11, %s363_s10 }
   0x6   : > { %p67_p1 = scmp.eq.s32.totalorder %s66_s17, 0  ;;  %p80_p2 = scmp.eq.s32.totalorder %s414_s13, 1 }
   0x7   : > { %p85_p3 = scmp.ne.s32.totalorder %s363_s10, %s359_s9  ;;  %p86_p4 = scmp.eq.s32.totalorder %s249_s14, 1 }
   0x8   : > { %s429_s18 = scalar_select %p67_p1, %s367_s11, %s69_s16  }
   0x9   : > { %p431_p5 = por %p80_p2, %p79_p0  ;;  %p435_p6 = por %p86_p4, %p85_p3 }
   0xa   : > { %p252_p7 = scmp.ge.s32.totalorder %s371_s12, 1  ;;  %p115_p8 = scmp.lt.s32.totalorder %s371_s12, 3 }
   0xc   : > { %p116_p9 = pnand %p252_p7, %p115_p8 }
   0xd   : > { %v144_v0 = vld [vmem:[%s503_s1] sm:$0xff] (!%p116_p9)  ;;  %v373_v1 = vmov (!%p116_p9), 1   ;;  %v374_v2 = vmov (!%p116_p9), 0   ;;  %v145_v3 = vld [vmem:[%s503_s1 + $0x8] sm:$0xff] (!%p116_p9)  ;;  %p137_p10 = scmp.lt.s32.totalorder (!%p116_p9), %s414_s13, 1  ;;  %s134_s30 = sand.u32 (!%p116_p9), 1, %s363_s10  }
   0xe   : > { %119 = sbr.rel (%p116_p9) target bundleno = 168 (0xa8), region = 28  ;;  %307 = vset.pattern.permute.xlu1 (!%p116_p9), %v373_v1  ;;  %306 = vset.pattern.permute.xlu0 (!%p116_p9), %v374_v2  ;;  %s253_s3 = sshll.u32 (!%p116_p9), %s134_s30, 4  ;;  %vm170_vm0 = vcmask (!%p116_p9), 261120  }
   0xf   : > { %159 = vperm.xlu1 (!%p116_p9), %307, %v144_v0   ;;  %148 = vperm.xlu0 (!%p116_p9), %306, %v144_v0   ;;  %s262_s4 = sshll.u32 (!%p116_p9), %s414_s13, 8  ;;  %s136_s5 = scalar_lea.vmem (!%p116_p9), [#allocation2], %s253_s3 }
  0x10   : > { %s187_s6 = sshll.u32 (!%p116_p9), %s136_s5, 4  ;;  %s457_s14 = scalar_lea.hbm (!%p116_p9), %s504_s2, %s262_s4  ;;  %s459_s6 = int_to_ptr.vmem [resolvable:$true] %s187_s6 }
  0x11   : > { %s461_s16 = scalar_lea.sflag (!%p116_p9), [#allocation3], %s134_s30  ;;  %s375_s17 = smov (!%p116_p9), [#allocation2]  }
  0x12   : > { %s313_s21 = sshll.u32 (!%p116_p9), %s375_s17, 4  ;;  %s314_s21 = int_to_ptr.vmem [resolvable:$false] %s313_s21 }
  0x13   : > { %163 = vperm.xlu1 (!%p116_p9), %307, %v145_v3   ;;  %153 = vperm.xlu0 (!%p116_p9), %306, %v145_v3   ;;  %s315_s22 = scalar_lea.vmem (!%p116_p9), %s314_s21, 512  ;;  %p316_p0 = scmp.lt.s32.totalorder (!%p116_p9), %s459_s6, %s314_s21 }
  0x15   : > { %s138_s25 = scalar_select %p137_p10, %s414_s13, 1 }
  0x16   : > { %s309_s13 = scalar_lea.vmem %s459_s6, 256 }
  0x17   : > { %308 = vset.pattern.permute.xlu0 %v373_v1  ;;  %s261_s26 = sshll.u32 %s138_s25, 4  ;;  %p310_p11 = scmp.ne.s32.totalorder %s459_s6, %s309_s13 }
  0x18   : > { %s141_s29 = scalar_lea.vmem %s502_s0, %s261_s26  ;;  %p317_p1 = scmp.lt.s32.totalorder %s315_s22, %s309_s13 }
  0x19   : > { %v142_v4 = vld [vmem:[%s141_s29] sm:$0xff]  ;;  %v143_v8 = vld [vmem:[%s141_s29 + $0x8] sm:$0xff]  ;;  %p311_p12 = pnand %p310_p11, %p431_p5 }
  0x1a   : > { %p318_p2 = por %p317_p1, %p316_p0 }
  0x1b   : > { %p312_p13 = pneg %p311_p12 }
  0x1d   : > { %p319_p3 = pnand %p318_p2, %p312_p13 }
  0x8e   : > { %v160_v5 = vpop.permute.xlu1 %159  ;;  %v149_v6 = vpop.permute.xlu0 %148 }
  0x8f   : > { %v156_v7 = vmul.f32 %v149_v6, %v142_v4 }
  0x91   : > { %v166_v9 = vadd.f32 %v160_v5, %v156_v7 }
  0x92   : > { %v154_v10 = vpop.permute.xlu0 %153  ;;  %v164_v13 = vpop.permute.xlu1 %163 }
  0x93   : > { %v168_v11 = vmax.f32 %v166_v9, 0.0  ;;  %v157_v12 = vmul.f32 %v154_v10, %v143_v8 }
  0x95   : > { %171 = vst.msk [vmem:[%s136_s5] sm:$0xff] %vm170_vm0, %v168_v11  ;;  %v167_v14 = vadd.f32 %v164_v13, %v157_v12 }
  0x97   : > { %v169_v15 = vmax.f32 %v167_v14, 0.0 }
  0x99   : > { %172 = vst.msk [vmem:[%s136_s5 + $0x8] sm:$0xff] %vm170_vm0, %v169_v15 }
  0x9a   : > { %322 = shalt.err (!%p319_p3)
}
  0x9b   : > { %s323_s23 = scalar_lea.hbm %s457_s14, 256  ;;  %s327_s26 = scalar_lea.hbm %s504_s2, 512 }
  0x9c   : > { %p324_p4 = scmp.ne.s32.totalorder %s457_s14, %s323_s23  ;;  %p328_p9 = scmp.lt.u32.totalorder %s457_s14, %s504_s2 }
  0x9d   : > { %p329_p10 = scmp.lt.u32.totalorder %s327_s26, %s323_s23  ;;  %p331_p12 = scmp.lt.u32.totalorder %s323_s23, %s457_s14 }
  0x9e   : > { %p325_p7 = pnand %p324_p4, %p431_p5 }
  0x9f   : > { %p330_p11 = por %p329_p10, %p328_p9 }
  0xa0   : > { %p326_p8 = pneg %p325_p7 }
  0xa1   : > { %p332_p13 = por %p331_p12, %p330_p11 }
  0xa3   : > { %p333_p0 = pnand %p332_p13, %p326_p8 }
  0xa5   : > { %336 = shalt.err (!%p333_p0)
}
  0xa6   : > { %s376_s29 = smov 128   ;;  %s377_s30 = smov 8  }
  0xa7   : > { %263 = dma.vmem_to_hbm [thread:$0]  (%p431_p5), %s459_s6, 256, %s457_s14, %s461_s16, %s376_s29, %s376_s29, %s377_s30  }
  0xa8 PF: > { %p269_p1 = scmp.ge.s32.totalorder %s371_s12, 2  ;;  %s202_s3 = sand.u32 1, %s359_s9  }
  0xa9   : > { %s203_s4 = scalar_lea.sflag [#allocation3], %s202_s3 }
  0xaa   : > { %p266_p2 = pnand %p269_p1, %p435_p6 }
  0xac   : > { %354 = dma.done.wait (!%p266_p2), %s203_s4, 256  }
  0xad   : > { %356 = vsyncadd (!%p266_p2), %s203_s4, 4294967040  ;;  %p12_p3 = scmp.ge.s32.totalorder %s418_s15, 4   ;;  %s507_s9 = smov %s363_s10 }
  0xae   : > { %s508_s10 = smov %s367_s11  ;;  %s509_s11 = smov %s429_s18 }
  0xaf   : > { %s510_s12 = smov %s418_s15  ;;  %14 = sbr.rel (!%p12_p3) target bundleno = 3 (0x3), region = 63 }
  0xb6   :  { %208 = vsyncpa [#allocation3], 1 }
  0xb7   :  { %210 = vsyncpa [#allocation3 + $0x1], 1 }

// kernel: up_forward.4
= control target key start
LH: loop header
LB: loop body
LE: loop exit
PB: predicated region body
PF: predicated region fallthrough
CT: control target
= control target key end

     0   :  { %s699_s15 = smov 0   ;;  %s750_s0 = inlined_call_operand.vmem [shape: f32[2,8,128], index: 0, kind: input, shape index: {}]   ;;  %s751_s1 = inlined_call_operand.vmem [shape: f32[8,2], index: 1, kind: input, shape index: {}]   ;;  %s752_s2 = inlined_call_operand.vmem [shape: f32[3,16,8], index: 2, kind: input, shape index: {}]   ;;  %s753_s3 = inlined_call_operand.vmem [shape: f32[2,16,128], index: 3, kind: output, shape index: {0}]   ;;  %s754_s4 = inlined_call_operand.vmem [shape: f32[2,16,128], index: 4, kind: output, shape index: {1}]  }
   0x1 LB: > { %s596_s16 = sadd.s32 4294967295, %s668_s15   ;;  %p600_p0 = scmp.ge.s32.totalorder %s668_s15, 1  ;;  %s668_s15 = sphi %s699_s15, %s15_s15  }
   0x2   : > { %p164_p1 = scmp.lt.s32.totalorder %s668_s15, 3 }
   0x4   : > { %p165_p2 = pnand %p600_p0, %p164_p1 }
   0x5   : > { %v209_v0 = vld [vmem:[%s751_s1] sm:$0xff] (!%p165_p2)  ;;  %v670_v1 = vmov (!%p165_p2), 0   ;;  %v671_v2 = vmov (!%p165_p2), 1   ;;  %vm231_vm0 = vcmask (!%p165_p2), 64512   ;;  %p194_p3 = scmp.lt.s32.totalorder (!%p165_p2), %s596_s16, 1  ;;  %v606_v5 = vld [vmem:[%s752_s2 + $0x10] sm:$0xff] (!%p165_p2) }
   0x6   : > { %168 = sbr.rel (%p165_p2) target bundleno = 630 (0x276), region = 32  ;;  %660 = vset.pattern.permute.xlu0 (!%p165_p2), %v670_v1  ;;  %v222_v3 = vld [vmem:[%s752_s2] sm:$0xff] (!%p165_p2)  ;;  %631 = vmatprep.mubr.msk.f32.mxu1 (!%p165_p2), %vm231_vm0, %v606_v5  ;;  %v223_v11 = vld [vmem:[%s752_s2 + $0x8] sm:$0xff] (!%p165_p2)  ;;  %s672_s29 = smov (!%p165_p2), 127   ;;  %v607_v14 = vld [vmem:[%s752_s2 + $0x18] sm:$0xff] (!%p165_p2)  ;;  %vm483_vm1 = vcmask (!%p165_p2), 261120  }
   0x7   : > { %212 = vperm.xlu0 (!%p165_p2), %660, %v209_v0   ;;  %636 = vmatprep.mubr.msk.f32.mxu0 (!%p165_p2), %vm231_vm0, %v222_v3  ;;  %v612_v12 = vld [vmem:[%s752_s2 + $0x20] sm:$0xff] (!%p165_p2)  ;;  %s673_s6 = smov (!%p165_p2), 126   ;;  %v613_v16 = vld [vmem:[%s752_s2 + $0x28] sm:$0xff] (!%p165_p2)  ;;  %vm498_vm2 = vcmask (!%p165_p2), 7168   ;;  %vm501_vm3 = vcmask (!%p165_p2), 15360  }
   0xb   : > { %661 = vset.pattern.permute.xlu0 (!%p165_p2), %v671_v2 }
   0xc   : > { %217 = vperm.xlu0 (!%p165_p2), %661, %v209_v0  }
   0xd   : > { %s756_s16 = smov (!%p194_p3, %s596_s16), 1 }
   0xe   : > { %s601_s21 = sshll.u32 %s756_s16, 3  ;;  %s618_s11 = sshll.u32 %s756_s16, 4 }
   0xf   : > { %s197_s24 = scalar_lea.vmem %s750_s0, %s601_s21  ;;  %s202_s14 = scalar_lea.vmem %s753_s3, %s618_s11 }
  0x10   : > { %v208_v6 = vld [vmem:[%s197_s24] sm:$0xff]  ;;  %s207_s18 = scalar_lea.vmem %s754_s4, %s618_s11 }
  0x86   : > { %v213_v4 = vpop.permute.xlu0 %212 }
  0x87   : > { %v215_v7 = vmul.f32 %v213_v4, %v208_v6 }
  0x8b   : > { %v218_v8 = vpop.permute.xlu0 %217 }
  0x8c   : > { %v220_v9 = vadd.f32 %v218_v8, %v215_v7 }
  0x8e   : > { %v221_v10 = vmax.f32 %v220_v9, 0.0 }
  0x90   : > { %228 = vrot.lane.b32.xlu1 %v221_v10, %s672_s29  ;;  %634 = vmatprep.subr.mxu0 %v221_v10 }
  0x91   : > { %635 = vmatpush3.msra.mxu0 %v221_v10 }
  0x92   : > { %637 = vmatmul.mubr.msk.f32.vlgmr.msra.gmra.mrb[0].mxu0 %vm231_vm0, %v223_v11 }
  0x93   : > { %641 = vmatprep.mubr.msk.f32.mxu0 %vm231_vm0, %v612_v12 }
  0x94   : > { %397 = vrot.lane.b32.xlu1 %v221_v10, %s673_s6 }
 0x102   : > { %v229_v13 = vpop.permute.xlu1 %228 }
 0x103   : > { %629 = vmatprep.subr.mxu1 %v229_v13 }
 0x104   : > { %630 = vmatpush3.msra.mxu1 %v229_v13 }
 0x105   : > { %632 = vmatmul.mubr.msk.f32.vlgmr.msra.gmra.mrb[0].mxu1 %vm231_vm0, %v607_v14 }
 0x106   : > { %v398_v15 = vpop.permute.xlu1 %397 }
 0x107   : > { %639 = vmatprep.subr.mxu0 %v398_v15 }
 0x108   : > { %640 = vmatpush3.msra.mxu0 %v398_v15 }
 0x109   : > { %642 = vmatmul.mubr.msk.f32.vlgmr.msra.gmra.mrb[0].mxu0 %vm231_vm0, %v613_v16 }
 0x1d8   : > { %v633_v17 = vpop.f32.mrb[0].mxu1 }
 0x1d9   : > { %v304_v18 = vpop.f32.mrb[1].mxu1 }
 0x1dc   : > { %v643_v19 = vpop.f32.mrb[0].mxu0 }
 0x1dd   : > { %v644_v20 = vadd.f32 %v643_v19, %v633_v17  ;;  %v472_v21 = vpop.f32.mrb[1].mxu0 }
 0x1de   : > { %v645_v22 = vadd.f32 %v472_v21, %v304_v18 }
 0x1df   : > { %v487_v23 = vsel %vm483_vm1, %v644_v20, 0.0  ;;  %v491_v26 = vmul.f32 %v644_v20, %v644_v20 }
 0x1e0   : > { %488 = vadd.xlane.f32.xlu0 %v487_v23  ;;  %507 = vst [vmem:[%s202_s14 + $0x8] sm:$0xff] %v487_v23  ;;  %v484_v24 = vsel %vm483_vm1, %v645_v22, 0.0  ;;  %v490_v25 = vmul.f32 %v645_v22, %v645_v22 }
 0x1e1   : > { %485 = vadd.xlane.f32.xlu1 %v484_v24  ;;  %506 = vst [vmem:[%s202_s14] sm:$0xff] %v484_v24  ;;  %v495_v28 = vsel %vm483_vm1, %v491_v26, 0.0 }
 0x1e2   : > { %v492_v27 = vsel %vm483_vm1, %v490_v25, 0.0 }
 0x1e4   : > { %493 = vadd.xlane.f32.xlu0 %v492_v27 }
 0x1e5   : > { %496 = vadd.xlane.f32.xlu1 %v495_v28 }
 0x26d   : > { %v489_v29 = vpop.xlane.xlu0 %488 }
 0x26e   : > { %v486_v30 = vpop.xlane.xlu1 %485 }
 0x271   : > { %v494_v31 = vpop.xlane.xlu0 %493 }
 0x272   : > { %v499_v32 = vsel %vm498_vm2, %v486_v30, %v494_v31  ;;  %v497_v33 = vpop.xlane.xlu1 %496 }
 0x273   : > { %v502_v34 = vsel %vm501_vm3, %v499_v32, 0.0  ;;  %v500_v35 = vsel %vm498_vm2, %v489_v29, %v497_v33 }
 0x274   : > { %504 = vst [vmem:[%s207_s18] sm:$0xff] %v502_v34  ;;  %v503_v36 = vsel %vm501_vm3, %v500_v35, 0.0 }
 0x275   : > { %505 = vst [vmem:[%s207_s18 + $0x8] sm:$0xff] %v503_v36 }
 0x276 PF: > { %s15_s15 = sadd.s32 1, %s668_s15  }
 0x277   : > { %p12_p4 = scmp.ge.s32.totalorder %s15_s15, 4  }
 0x279   :  { %14 = sbr.rel (!%p12_p4) target bundleno = 1 (0x1), region = 76 }

// kernel: up_forward.3
= control target key start
LH: loop header
LB: loop body
LE: loop exit
PB: predicated region body
PF: predicated region fallthrough
CT: control target
= control target key end

     0   :  { %s608_s12 = smov 0   ;;  %s645_s0 = inlined_call_operand.vmem [shape: f32[2,8,128], index: 0, kind: input, shape index: {}]   ;;  %s646_s1 = inlined_call_operand.vmem [shape: f32[3,8,8], index: 1, kind: input, shape index: {}]   ;;  %s647_s2 = inlined_call_operand.vmem [shape: f32[2,8,128], index: 2, kind: output, shape index: {0}]   ;;  %s648_s3 = inlined_call_operand.vmem [shape: f32[2,8,128], index: 3, kind: output, shape index: {1}]  }
   0x1 LB: > { %s521_s13 = sadd.s32 4294967295, %s580_s12   ;;  %p525_p0 = scmp.ge.s32.totalorder %s580_s12, 1  ;;  %s580_s12 = sphi %s608_s12, %s14_s12  }
   0x2   : > { %p139_p1 = scmp.lt.s32.totalorder %s580_s12, 3 }
   0x4   : > { %p140_p2 = pnand %p525_p0, %p139_p1 }
   0x5   : > { %p165_p3 = scmp.lt.s32.totalorder (!%p140_p2), %s521_s13, 1  ;;  %v582_v0 = vmov (!%p140_p2), 0.0   ;;  %vm583_vm0 = vmmov (!%p140_p2), 0   ;;  %v178_v1 = vld [vmem:[%s646_s1] sm:$0xff] (!%p140_p2)  ;;  %vm185_vm1 = vcmask (!%p140_p2), 64512   ;;  %s584_s20 = smov (!%p140_p2), 127  }
   0x6   : > { %143 = sbr.rel (%p140_p2) target bundleno = 505 (0x1f9), region = 28  ;;  %547 = vmatprep.subr.mxu0 (!%p140_p2), %v582_v0  ;;  %549 = vmatprep.mubr.msk.f32.mxu0 (!%p140_p2), %vm583_vm0, %v582_v0  ;;  %s585_s21 = smov (!%p140_p2), 126   ;;  %v529_v3 = vld [vmem:[%s646_s1 + $0x8] sm:$0xff] (!%p140_p2)  ;;  %v532_v5 = vld [vmem:[%s646_s1 + $0x10] sm:$0xff] (!%p140_p2)  ;;  %vm411_vm2 = vcmask (!%p140_p2), 261120   ;;  %vm421_vm3 = vcmask (!%p140_p2), 15360  }
   0x7   : > { %542 = vmatprep.subr.mxu1 (!%p140_p2), %v582_v0  ;;  %544 = vmatprep.mubr.msk.f32.mxu1 (!%p140_p2), %vm583_vm0, %v582_v0  ;;  %s586_s26 = smov (!%p140_p2), 1   ;;  %s587_s27 = smov (!%p140_p2), 2   ;;  %vm419_vm4 = vcmask (!%p140_p2), 7168   ;;  %vm432_vm5 = vcmask (!%p140_p2), 269312   ;;  %vm434_vm6 = vcmask (!%p140_p2), 277504  }
   0xd   : > { %s650_s13 = smov (!%p165_p3, %s521_s13), 1 }
   0xe   : > { %s616_s14 = sshll.u32 %s650_s13, 3 }
   0xf   : > { %s168_s17 = scalar_lea.vmem %s645_s0, %s616_s14  ;;  %s176_s30 = scalar_lea.vmem %s648_s3, %s616_s14 }
  0x10   : > { %v177_v2 = vld [vmem:[%s168_s17] sm:$0xff]  ;;  %s172_s6 = scalar_lea.vmem %s647_s2, %s616_s14 }
  0x11   : > { %182 = vrot.lane.b32.xlu0 %v177_v2, %s584_s20  ;;  %548 = vmatpush3.msra.mxu0 %v177_v2 }
  0x12   : > { %550 = vmatmul.mubr.msk.f32.vlgmr.msra.gmra.mrb[0].mxu0 %vm185_vm1, %v178_v1  ;;  %552 = vmatprep.subr.mxu0 %v582_v0 }
  0x13   : > { %554 = vmatprep.mubr.msk.f32.mxu0 %vm583_vm0, %v582_v0 }
  0x15   : > { %334 = vrot.lane.b32.xlu0 %v177_v2, %s585_s21 }
  0x83   : > { %v183_v4 = vpop.permute.xlu0 %182 }
  0x84   : > { %543 = vmatpush3.msra.mxu1 %v183_v4 }
  0x85   : > { %545 = vmatmul.mubr.msk.f32.vlgmr.msra.gmra.mrb[0].mxu1 %vm185_vm1, %v529_v3 }
  0x87   : > { %v335_v6 = vpop.permute.xlu0 %334 }
  0x88   : > { %553 = vmatpush3.msra.mxu0 %v335_v6 }
  0x89   : > { %555 = vmatmul.mubr.msk.f32.vlgmr.msra.gmra.mrb[0].mxu0 %vm185_vm1, %v532_v5 }
 0x158   : > { %v255_v7 = vpop.f32.mrb[0].mxu1 }
 0x159   : > { %v546_v8 = vpop.f32.mrb[1].mxu1 }
 0x15c   : > { %v406_v9 = vpop.f32.mrb[0].mxu0 }
 0x15d   : > { %v557_v10 = vadd.f32 %v406_v9, %v255_v7  ;;  %v556_v11 = vpop.f32.mrb[1].mxu0 }
 0x15f   : > { %425 = vrot.lane.b32.xlu0 %v557_v10, %s586_s26  ;;  %v412_v12 = vsel %vm411_vm2, %v557_v10, 0.0  ;;  %v415_v13 = vmul.f32 %v557_v10, %v557_v10 }
 0x160   : > { %413 = vadd.xlane.f32.xlu1 %v412_v12 }
 0x161   : > { %v416_v14 = vsel %vm411_vm2, %v415_v13, 0.0 }
 0x164   : > { %417 = vadd.xlane.f32.xlu1 %v416_v14 }
 0x175   : > { %428 = vrot.lane.b32.xlu1 %v557_v10, %s587_s27 }
 0x1d1   : > { %v426_v17 = vpop.permute.xlu0 %425 }
 0x1d2   : > { %v431_v20 = vsel %vm419_vm4, %v557_v10, %v426_v17 }
 0x1ed   : > { %v414_v15 = vpop.xlane.xlu1 %413 }
 0x1f1   : > { %v418_v16 = vpop.xlane.xlu1 %417 }
 0x1f2   : > { %v420_v18 = vsel %vm419_vm4, %v414_v15, %v418_v16 }
 0x1f3   : > { %v422_v19 = vsel %vm421_vm3, %v420_v18, 0.0 }
 0x1f4   : > { %423 = vst [vmem:[%s176_s30] sm:$0xff] %v422_v19 }
 0x1f5   : > { %v429_v21 = vpop.permute.xlu1 %428 }
 0x1f6   : > { %v433_v22 = vsel %vm432_vm5, %v431_v20, %v429_v21 }
 0x1f7   : > { %v435_v23 = vsel %vm434_vm6, %v433_v22, 0.0 }
 0x1f8   : > { %436 = vst [vmem:[%s172_s6] sm:$0xff] %v435_v23 }
 0x1f9 PF: > { %s14_s12 = sadd.s32 1, %s580_s12  }
 0x1fa   : > { %p11_p4 = scmp.ge.s32.totalorder %s14_s12, 4  }
 0x1fc   :  { %13 = sbr.rel (!%p11_p4) target bundleno = 1 (0x1), region = 72 }

</bundles_post_ra>
